<compile_context>
chip_gen: v5e
topology: v5e:2x2
jax: 0.10.0
libtpu: 0.0.40
codegen_flags: <defaults>
</compile_context>

<pallas_src>
import jax
import jax.numpy as jnp
from jax.experimental import pallas as pl
from jax.experimental.pallas import tpu as pltpu


def normalizing_flow_kernel(w_ref, st_ref, b_ref, m_ref, z_ref,
                            zk_ref, logq_ref):
    """Runs the whole flow chain on one batch tile, fully in VMEM/SMEM.

    w_ref   : (L, D)   f32 VMEM  per-flow planar weight (rows)
    st_ref  : (D, L)   f32 VMEM  per-flow scale, transposed (columns)
    b_ref   : (L,)     f32 SMEM  per-flow bias (scalar reads)
    m_ref   : (L*L,)   f32 SMEM  M[k, j] = w_k . s_j, flattened (scalar reads)
    z_ref   : (bt, D)  f32 VMEM  batch tile, straight from the (B, D) input
    zk_ref  : (bt, D)  f32 VMEM  transformed batch tile
    logq_ref: (L, bt)  f32 VMEM  log|det J| of flow k at pre-transform z_k
    """
    num_flows = w_ref.shape[0]

    # Put the batch on the lane axis for all per-flow math.
    z_db = jnp.transpose(z_ref[...])                          # (D, bt)  XLU
    # act0[k, b] = w_k . z0_b  — one MXU matmul instead of L VPU reduces.
    a0 = jnp.dot(w_ref[...], z_db,
                 preferred_element_type=jnp.float32)          # (L, bt)  MXU

    # TODO(synk): if L grows beyond a handful, switch this static unroll to a
    # lax.fori_loop with a (L, bt) VMEM scratch for the tanh rows.
    t_rows = []
    for k in range(num_flows):                                # static unroll
        act = a0[k:k + 1, :] + b_ref[k]                       # (1, bt)
        for j in range(k):
            # act_k = w_k . z_k + b_k with z_k = z_0 + sum_{j<k} s_j t_j
            act = act + m_ref[k * num_flows + j] * t_rows[j]
        t = jnp.tanh(act)                                     # (1, bt) EUP

        # log-det-Jacobian at the *current* z (pre-transform), hoisted form:
        # 1 + sum((1-t^2)*w_k * s_k) == 1 + (1-t^2) * (w_k . s_k)
        det_grad = 1.0 + (1.0 - t * t) * m_ref[k * num_flows + k]
        logq_ref[k:k + 1, :] = jnp.log(jnp.abs(det_grad) + 1e-9)

        t_rows.append(t)

    # z_K = z_0 + S^T @ T  (the source module omits the u_hat invertibility
    # correction; we match it exactly).
    t_lb = jnp.concatenate(t_rows, axis=0)                    # (L, bt)
    delta_db = jnp.dot(st_ref[...], t_lb,
                       preferred_element_type=jnp.float32)    # (D, bt) MXU
    zk_ref[...] = z_ref[...] + jnp.transpose(delta_db)        # (bt, D)


def _choose_tiling(batch):
    """Pick a lane-aligned batch tile; prefer >= 8 grid steps, pad batch up."""
    bt = 16384
    while bt > 128 and batch < 8 * bt:
        bt //= 2
    padded = ((batch + bt - 1) // bt) * bt
    return bt, padded


def normalizing_flow(z, weights, biases, scales):
    """z: (B, D); weights/scales: (L, D); biases: (L, 1).

    Returns (zk (B, D), log_q (L, B, 1)) matching the PyTorch forward
    (log_q stacked over the flow index).
    """
    B, D = z.shape
    L = weights.shape[0]
    f32 = jnp.float32

    w = weights.astype(f32)                                   # (L, D)
    s = scales.astype(f32)                                    # (L, D)
    st = s.T                                                  # (D, L)
    b = biases.reshape(L).astype(f32)                         # (L,)
    m = (w @ s.T).reshape(L * L)                              # M[k,j] = w_k.s_j

    bt, Bp = _choose_tiling(B)
    z_in = z.astype(f32)
    if Bp != B:
        z_in = jnp.pad(z_in, ((0, Bp - B), (0, 0)))           # tail pad only

    grid = (Bp // bt,)
    smem = pl.BlockSpec(memory_space=pltpu.MemorySpace.SMEM)

    zk, logq = pl.pallas_call(
        normalizing_flow_kernel,
        out_shape=(
            jax.ShapeDtypeStruct((Bp, D), f32),
            jax.ShapeDtypeStruct((L, Bp), f32),
        ),
        grid=grid,
        in_specs=[
            pl.BlockSpec((L, D), lambda i: (0, 0)),           # weights (full)
            pl.BlockSpec((D, L), lambda i: (0, 0)),           # scales^T (full)
            smem,                                             # biases (scalars)
            smem,                                             # M = W S^T (scalars)
            pl.BlockSpec((bt, D), lambda i: (i, 0)),          # z batch tile
        ],
        out_specs=(
            pl.BlockSpec((bt, D), lambda i: (i, 0)),          # zk batch tile
            pl.BlockSpec((L, bt), lambda i: (0, i)),          # logq slab
        ),
        compiler_params=pltpu.CompilerParams(
            dimension_semantics=("parallel",),
            vmem_limit_bytes=40 * 1024 * 1024),
    )(w, st, b, m, z_in)

    if Bp != B:
        zk = zk[:B]
        logq = logq[:, :B]
    return zk, logq[:, :, None]


def normalizing_flow_ref(z, weights, biases, scales):
    """Plain-JAX reference mirroring the PyTorch forward exactly."""
    log_q = []
    for k in range(weights.shape[0]):
        w = weights[k:k + 1]                      # (1, D)
        s = scales[k:k + 1]                       # (1, D)
        b = biases[k, 0]
        act = z @ w.T + b                         # (B, 1)
        t = jnp.tanh(act)
        psi = (1.0 - t ** 2) * w                  # (B, D)
        det_grad = 1.0 + psi @ s.T                # (B, 1)
        log_q.append(jnp.log(jnp.abs(det_grad) + 1e-9))
        z = z + s * t
    return z, jnp.stack(log_q, axis=0)


if __name__ == "__main__":
    B, D, L = 8, 32, 4                            # batch, latent dim, flow length

    key = jax.random.PRNGKey(0)
    kz, kw, kb, ks = jax.random.split(key, 4)

    z = jax.random.normal(kz, (B, D), dtype=jnp.float32)
    # PlanarFlow.reset_parameters(): uniform_(-0.01, 0.01)
    weights = jax.random.uniform(kw, (L, D), minval=-0.01, maxval=0.01, dtype=jnp.float32)
    biases = jax.random.uniform(kb, (L, 1), minval=-0.01, maxval=0.01, dtype=jnp.float32)
    scales = jax.random.uniform(ks, (L, D), minval=-0.01, maxval=0.01, dtype=jnp.float32)

    zk, log_q = normalizing_flow(z, weights, biases, scales)
    jax.block_until_ready((zk, log_q))

    zk_ref, log_q_ref = normalizing_flow_ref(z, weights, biases, scales)
    assert jnp.allclose(zk, zk_ref, atol=1e-5, rtol=1e-5)
    assert jnp.allclose(log_q, log_q_ref, atol=1e-5, rtol=1e-5)

    print("KERNEL_OK")
</pallas_src>

<mosaic_0001>
module attributes {stable_mosaic.version = 11 : i64} {
  func.func @normalizing_flow_kernel(%arg0: i32, %arg1: memref<4x32xf32, #tpu.memory_space<vmem>>, %arg2: memref<32x4xf32, #tpu.memory_space<vmem>>, %arg3: memref<4xf32, #tpu.memory_space<smem>>, %arg4: memref<16xf32, #tpu.memory_space<smem>>, %arg5: memref<128x32xf32, #tpu.memory_space<vmem>>, %arg6: memref<128x32xf32, #tpu.memory_space<vmem>>, %arg7: memref<4x128xf32, #tpu.memory_space<vmem>>) attributes {dimension_semantics = [#tpu.dimension_semantics<parallel>], iteration_bounds = array<i64: 1>, scalar_prefetch = 0 : i64, scratch_operands = 0 : i64, tpu.core_type = #tpu.core_type<tc>, window_params = [{pipeline_mode = #tpu.pipeline_mode<synchronous>, transform_indices = @transform_0, window_bounds = array<i64: 4, 32>}, {pipeline_mode = #tpu.pipeline_mode<synchronous>, transform_indices = @transform_1, window_bounds = array<i64: 32, 4>}, {transform_indices = @transform_2, window_bounds = array<i64: 4>}, {transform_indices = @transform_3, window_bounds = array<i64: 16>}, {transform_indices = @transform_4, window_bounds = array<i64: 128, 32>}, {transform_indices = @transform_5, window_bounds = array<i64: 128, 32>}, {transform_indices = @transform_6, window_bounds = array<i64: 4, 128>}]} {
    %c0 = arith.constant 0 : index
    %c0_0 = arith.constant 0 : index
    %0 = vector.load %arg5[%c0, %c0_0] : memref<128x32xf32, #tpu.memory_space<vmem>>, vector<128x32xf32>
    %1 = tpu.transpose %0, [1, 0] : vector<128x32xf32> -> vector<32x128xf32>
    %c0_1 = arith.constant 0 : index
    %c0_2 = arith.constant 0 : index
    %2 = vector.load %arg1[%c0_1, %c0_2] : memref<4x32xf32, #tpu.memory_space<vmem>>, vector<4x32xf32>
    %cst = arith.constant dense<0.000000e+00> : vector<4x128xf32>
    %3 = tpu.matmul %2, %1, %cst {dimension_numbers = #tpu.dot_dimension_numbers<[1], [0], [0], [1], [0, 0, 1, 1], [], []>} : vector<4x32xf32>, vector<32x128xf32>, vector<4x128xf32> -> vector<4x128xf32>
    %4 = vector.extract_strided_slice %3 {offsets = [0, 0], sizes = [1, 128], strides = [1, 1]} : vector<4x128xf32> to vector<1x128xf32>
    %c0_3 = arith.constant 0 : index
    %5 = memref.load %arg3[%c0_3] : memref<4xf32, #tpu.memory_space<smem>>
    %6 = vector.broadcast %5 : f32 to vector<1x128xf32>
    %7 = arith.addf %4, %6 : vector<1x128xf32>
    %8 = math.tanh %7 : vector<1x128xf32>
    %9 = arith.mulf %8, %8 : vector<1x128xf32>
    %cst_4 = arith.constant 1.000000e+00 : f32
    %10 = vector.broadcast %cst_4 : f32 to vector<1x128xf32>
    %11 = arith.subf %10, %9 : vector<1x128xf32>
    %c0_5 = arith.constant 0 : index
    %12 = memref.load %arg4[%c0_5] : memref<16xf32, #tpu.memory_space<smem>>
    %13 = vector.broadcast %12 : f32 to vector<1x128xf32>
    %14 = arith.mulf %11, %13 : vector<1x128xf32>
    %cst_6 = arith.constant 1.000000e+00 : f32
    %15 = vector.broadcast %cst_6 : f32 to vector<1x128xf32>
    %16 = arith.addf %15, %14 : vector<1x128xf32>
    %17 = math.absf %16 : vector<1x128xf32>
    %cst_7 = arith.constant 9.99999971E-10 : f32
    %18 = vector.broadcast %cst_7 : f32 to vector<1x128xf32>
    %19 = arith.addf %17, %18 : vector<1x128xf32>
    %20 = math.log %19 : vector<1x128xf32>
    %c0_8 = arith.constant 0 : index
    %c0_9 = arith.constant 0 : index
    %21 = vector.load %arg7[%c0_8, %c0_9] : memref<4x128xf32, #tpu.memory_space<vmem>>, vector<1x128xf32>
    tpu.vector_store %arg7[%c0_8, %c0_9], %20 {strides = array<i32>} : memref<4x128xf32, #tpu.memory_space<vmem>>, vector<1x128xf32>,
    %22 = vector.extract_strided_slice %3 {offsets = [1, 0], sizes = [1, 128], strides = [1, 1]} : vector<4x128xf32> to vector<1x128xf32>
    %c1 = arith.constant 1 : index
    %23 = memref.load %arg3[%c1] : memref<4xf32, #tpu.memory_space<smem>>
    %24 = vector.broadcast %23 : f32 to vector<1x128xf32>
    %25 = arith.addf %22, %24 : vector<1x128xf32>
    %c4 = arith.constant 4 : index
    %26 = memref.load %arg4[%c4] : memref<16xf32, #tpu.memory_space<smem>>
    %27 = vector.broadcast %26 : f32 to vector<1x128xf32>
    %28 = arith.mulf %27, %8 : vector<1x128xf32>
    %29 = arith.addf %25, %28 : vector<1x128xf32>
    %30 = math.tanh %29 : vector<1x128xf32>
    %31 = arith.mulf %30, %30 : vector<1x128xf32>
    %cst_10 = arith.constant 1.000000e+00 : f32
    %32 = vector.broadcast %cst_10 : f32 to vector<1x128xf32>
    %33 = arith.subf %32, %31 : vector<1x128xf32>
    %c5 = arith.constant 5 : index
    %34 = memref.load %arg4[%c5] : memref<16xf32, #tpu.memory_space<smem>>
    %35 = vector.broadcast %34 : f32 to vector<1x128xf32>
    %36 = arith.mulf %33, %35 : vector<1x128xf32>
    %cst_11 = arith.constant 1.000000e+00 : f32
    %37 = vector.broadcast %cst_11 : f32 to vector<1x128xf32>
    %38 = arith.addf %37, %36 : vector<1x128xf32>
    %39 = math.absf %38 : vector<1x128xf32>
    %cst_12 = arith.constant 9.99999971E-10 : f32
    %40 = vector.broadcast %cst_12 : f32 to vector<1x128xf32>
    %41 = arith.addf %39, %40 : vector<1x128xf32>
    %42 = math.log %41 : vector<1x128xf32>
    %c1_13 = arith.constant 1 : index
    %c0_14 = arith.constant 0 : index
    %43 = vector.load %arg7[%c1_13, %c0_14] : memref<4x128xf32, #tpu.memory_space<vmem>>, vector<1x128xf32>
    tpu.vector_store %arg7[%c1_13, %c0_14], %42 {strides = array<i32>} : memref<4x128xf32, #tpu.memory_space<vmem>>, vector<1x128xf32>,
    %44 = vector.extract_strided_slice %3 {offsets = [2, 0], sizes = [1, 128], strides = [1, 1]} : vector<4x128xf32> to vector<1x128xf32>
    %c2 = arith.constant 2 : index
    %45 = memref.load %arg3[%c2] : memref<4xf32, #tpu.memory_space<smem>>
    %46 = vector.broadcast %45 : f32 to vector<1x128xf32>
    %47 = arith.addf %44, %46 : vector<1x128xf32>
    %c8 = arith.constant 8 : index
    %48 = memref.load %arg4[%c8] : memref<16xf32, #tpu.memory_space<smem>>
    %49 = vector.broadcast %48 : f32 to vector<1x128xf32>
    %50 = arith.mulf %49, %8 : vector<1x128xf32>
    %51 = arith.addf %47, %50 : vector<1x128xf32>
    %c9 = arith.constant 9 : index
    %52 = memref.load %arg4[%c9] : memref<16xf32, #tpu.memory_space<smem>>
    %53 = vector.broadcast %52 : f32 to vector<1x128xf32>
    %54 = arith.mulf %53, %30 : vector<1x128xf32>
    %55 = arith.addf %51, %54 : vector<1x128xf32>
    %56 = math.tanh %55 : vector<1x128xf32>
    %57 = arith.mulf %56, %56 : vector<1x128xf32>
    %cst_15 = arith.constant 1.000000e+00 : f32
    %58 = vector.broadcast %cst_15 : f32 to vector<1x128xf32>
    %59 = arith.subf %58, %57 : vector<1x128xf32>
    %c10 = arith.constant 10 : index
    %60 = memref.load %arg4[%c10] : memref<16xf32, #tpu.memory_space<smem>>
    %61 = vector.broadcast %60 : f32 to vector<1x128xf32>
    %62 = arith.mulf %59, %61 : vector<1x128xf32>
    %cst_16 = arith.constant 1.000000e+00 : f32
    %63 = vector.broadcast %cst_16 : f32 to vector<1x128xf32>
    %64 = arith.addf %63, %62 : vector<1x128xf32>
    %65 = math.absf %64 : vector<1x128xf32>
    %cst_17 = arith.constant 9.99999971E-10 : f32
    %66 = vector.broadcast %cst_17 : f32 to vector<1x128xf32>
    %67 = arith.addf %65, %66 : vector<1x128xf32>
    %68 = math.log %67 : vector<1x128xf32>
    %c2_18 = arith.constant 2 : index
    %c0_19 = arith.constant 0 : index
    %69 = vector.load %arg7[%c2_18, %c0_19] : memref<4x128xf32, #tpu.memory_space<vmem>>, vector<1x128xf32>
    tpu.vector_store %arg7[%c2_18, %c0_19], %68 {strides = array<i32>} : memref<4x128xf32, #tpu.memory_space<vmem>>, vector<1x128xf32>,
    %70 = vector.extract_strided_slice %3 {offsets = [3, 0], sizes = [1, 128], strides = [1, 1]} : vector<4x128xf32> to vector<1x128xf32>
    %c3 = arith.constant 3 : index
    %71 = memref.load %arg3[%c3] : memref<4xf32, #tpu.memory_space<smem>>
    %72 = vector.broadcast %71 : f32 to vector<1x128xf32>
    %73 = arith.addf %70, %72 : vector<1x128xf32>
    %c12 = arith.constant 12 : index
    %74 = memref.load %arg4[%c12] : memref<16xf32, #tpu.memory_space<smem>>
    %75 = vector.broadcast %74 : f32 to vector<1x128xf32>
    %76 = arith.mulf %75, %8 : vector<1x128xf32>
    %77 = arith.addf %73, %76 : vector<1x128xf32>
    %c13 = arith.constant 13 : index
    %78 = memref.load %arg4[%c13] : memref<16xf32, #tpu.memory_space<smem>>
    %79 = vector.broadcast %78 : f32 to vector<1x128xf32>
    %80 = arith.mulf %79, %30 : vector<1x128xf32>
    %81 = arith.addf %77, %80 : vector<1x128xf32>
    %c14 = arith.constant 14 : index
    %82 = memref.load %arg4[%c14] : memref<16xf32, #tpu.memory_space<smem>>
    %83 = vector.broadcast %82 : f32 to vector<1x128xf32>
    %84 = arith.mulf %83, %56 : vector<1x128xf32>
    %85 = arith.addf %81, %84 : vector<1x128xf32>
    %86 = math.tanh %85 : vector<1x128xf32>
    %87 = arith.mulf %86, %86 : vector<1x128xf32>
    %cst_20 = arith.constant 1.000000e+00 : f32
    %88 = vector.broadcast %cst_20 : f32 to vector<1x128xf32>
    %89 = arith.subf %88, %87 : vector<1x128xf32>
    %c15 = arith.constant 15 : index
    %90 = memref.load %arg4[%c15] : memref<16xf32, #tpu.memory_space<smem>>
    %91 = vector.broadcast %90 : f32 to vector<1x128xf32>
    %92 = arith.mulf %89, %91 : vector<1x128xf32>
    %cst_21 = arith.constant 1.000000e+00 : f32
    %93 = vector.broadcast %cst_21 : f32 to vector<1x128xf32>
    %94 = arith.addf %93, %92 : vector<1x128xf32>
    %95 = math.absf %94 : vector<1x128xf32>
    %cst_22 = arith.constant 9.99999971E-10 : f32
    %96 = vector.broadcast %cst_22 : f32 to vector<1x128xf32>
    %97 = arith.addf %95, %96 : vector<1x128xf32>
    %98 = math.log %97 : vector<1x128xf32>
    %c3_23 = arith.constant 3 : index
    %c0_24 = arith.constant 0 : index
    %99 = vector.load %arg7[%c3_23, %c0_24] : memref<4x128xf32, #tpu.memory_space<vmem>>, vector<1x128xf32>
    tpu.vector_store %arg7[%c3_23, %c0_24], %98 {strides = array<i32>} : memref<4x128xf32, #tpu.memory_space<vmem>>, vector<1x128xf32>,
    %100 = tpu.concatenate %8, %30, %56, %86 in 0 : vector<1x128xf32>, vector<1x128xf32>, vector<1x128xf32>, vector<1x128xf32> -> vector<4x128xf32>
    %c0_25 = arith.constant 0 : index
    %c0_26 = arith.constant 0 : index
    %101 = vector.load %arg2[%c0_25, %c0_26] : memref<32x4xf32, #tpu.memory_space<vmem>>, vector<32x4xf32>
    %cst_27 = arith.constant dense<0.000000e+00> : vector<32x128xf32>
    %102 = tpu.matmul %101, %100, %cst_27 {dimension_numbers = #tpu.dot_dimension_numbers<[1], [0], [0], [1], [0, 0, 1, 1], [], []>} : vector<32x4xf32>, vector<4x128xf32>, vector<32x128xf32> -> vector<32x128xf32>
    %c0_28 = arith.constant 0 : index
    %c0_29 = arith.constant 0 : index
    %103 = vector.load %arg5[%c0_28, %c0_29] : memref<128x32xf32, #tpu.memory_space<vmem>>, vector<128x32xf32>
    %104 = tpu.transpose %102, [1, 0] : vector<32x128xf32> -> vector<128x32xf32>
    %105 = arith.addf %103, %104 : vector<128x32xf32>
    %c0_30 = arith.constant 0 : index
    %c0_31 = arith.constant 0 : index
    %106 = vector.load %arg6[%c0_30, %c0_31] : memref<128x32xf32, #tpu.memory_space<vmem>>, vector<128x32xf32>
    tpu.vector_store %arg6[%c0_30, %c0_31], %105 {strides = array<i32>} : memref<128x32xf32, #tpu.memory_space<vmem>>, vector<128x32xf32>,
    return
  }
  func.func @transform_0(%arg0: i32) -> (i32, i32) {
    %c0_i32 = arith.constant 0 : i32
    %c0_i32_0 = arith.constant 0 : i32
    %c0_i32_1 = arith.constant 0 : i32
    return %c0_i32, %c0_i32_0 : i32, i32
  }
  func.func @transform_1(%arg0: i32) -> (i32, i32) {
    %c0_i32 = arith.constant 0 : i32
    %c0_i32_0 = arith.constant 0 : i32
    %c0_i32_1 = arith.constant 0 : i32
    return %c0_i32, %c0_i32_0 : i32, i32
  }
  func.func @transform_2(%arg0: i32) -> i32 {
    %c0_i32 = arith.constant 0 : i32
    %c0_i32_0 = arith.constant 0 : i32
    return %c0_i32 : i32
  }
  func.func @transform_3(%arg0: i32) -> i32 {
    %c0_i32 = arith.constant 0 : i32
    %c0_i32_0 = arith.constant 0 : i32
    return %c0_i32 : i32
  }
  func.func @transform_4(%arg0: i32) -> (i32, i32) {
    %c0_i32 = arith.constant 0 : i32
    %c0_i32_0 = arith.constant 0 : i32
    return %arg0, %c0_i32 : i32, i32
  }
  func.func @transform_5(%arg0: i32) -> (i32, i32) {
    %c0_i32 = arith.constant 0 : i32
    %c0_i32_0 = arith.constant 0 : i32
    return %arg0, %c0_i32 : i32, i32
  }
  func.func @transform_6(%arg0: i32) -> (i32, i32) {
    %c0_i32 = arith.constant 0 : i32
    %c0_i32_0 = arith.constant 0 : i32
    return %c0_i32, %arg0 : i32, i32
  }
}

</mosaic_0001>

<bundles_post_ra>
// kernel: tpu_custom_call.1
= control target key start
LH: loop header
LB: loop body
LE: loop exit
PB: predicated region body
PF: predicated region fallthrough
CT: control target
= control target key end

     0   :  { %12 = vsyncpa [#allocation4], 0  ;;  %s772_s0 = inlined_call_operand.vmem [shape: f32[4,32], index: 0, kind: input, shape index: {}]   ;;  %s773_s1 = inlined_call_operand.vmem [shape: f32[32,4], index: 1, kind: input, shape index: {}]   ;;  %s774_s2 = inlined_call_operand.vmem [shape: f32[4], index: 2, kind: input, shape index: {}]   ;;  %s775_s3 = inlined_call_operand.vmem [shape: f32[16], index: 3, kind: input, shape index: {}]   ;;  %s776_s4 = inlined_call_operand.vmem [shape: f32[128,32], index: 4, kind: input, shape index: {}]   ;;  %s777_s5 = inlined_call_operand.vmem [shape: f32[128,32], index: 5, kind: output, shape index: {0}]   ;;  %s778_s6 = inlined_call_operand.hbm [shape: f32[4,128], index: 6, kind: output, shape index: {1}]  }
   0x1   :  { %13 = vsyncpa [#allocation6], 0 }
   0x2   :  { %14 = vsyncpa [#allocation3], 0  ;;  %s24_s23 = sshll.u32 %s774_s2, 4  ;;  %s33_s26 = sshll.u32 %s775_s3, 4  ;;  %s25_s23 = int_to_ptr.vmem [resolvable:$true] %s24_s23  ;;  %s34_s26 = int_to_ptr.vmem [resolvable:$true] %s33_s26 }
   0x3   :  { %s505_s27 = smov [#allocation2]   ;;  %s506_s28 = smov [#allocation5]  }
   0x4   :  { %27 = dma.vmem_to_smem %s25_s23, 16, %s505_s27, [#allocation4]  }
   0x5   :  { %36 = dma.vmem_to_smem %s34_s26, 16, %s506_s28, [#allocation6]  }
   0x6   :  { %499 = dma.done.wait [#allocation4], 16  }
   0x7   :  { %500 = vsyncadd [#allocation4], 4294967280 }
   0x8   :  { %501 = dma.done.wait [#allocation6], 16  }
   0x9   :  { %502 = vsyncadd [#allocation6], 4294967280 }
   0xa   :  { %47 = sfence }
   0xb   :  { %v552_v0 = vld [vmem:[%s776_s4 + $0x78] sm:$0xff]  ;;  %vm65_vm0 = vcmask 261120   ;;  %v559_v1 = vld [vmem:[%s776_s4 + $0x70] sm:$0xff]  ;;  %v566_v2 = vld [vmem:[%s776_s4 + $0x68] sm:$0xff]  ;;  %s137_s11 = sld [smem:[#allocation2]]  ;;  %vm239_vm1 = vcmask 1040384  }
   0xc   :  { %397 = vmatpush.xpose.msk.msra.mxu0 %vm65_vm0, %v552_v0  ;;  %v573_v3 = vld [vmem:[%s776_s4 + $0x60] sm:$0xff]  ;;  %v580_v4 = vld [vmem:[%s776_s4 + $0x58] sm:$0xff]  ;;  %v587_v5 = vld [vmem:[%s776_s4 + $0x50] sm:$0xff]  ;;  %s415_s12 = sld [smem:[#allocation5 + $0x4]]  ;;  %vm241_vm2 = vcmask 1041408   ;;  %vm243_vm3 = vcmask 1042432  }
   0xd   :  { %v594_v6 = vld [vmem:[%s776_s4 + $0x48] sm:$0xff]  ;;  %v601_v7 = vld [vmem:[%s776_s4 + $0x40] sm:$0xff]  ;;  %v608_v8 = vld [vmem:[%s776_s4 + $0x38] sm:$0xff]  ;;  %s414_s13 = sld [smem:[#allocation2 + $0x1]]  ;;  %vm262_vm4 = vcmask 1043456   ;;  %vm249_vm5 = vcmask 31744  }
   0xe   :  { %v615_v9 = vld [vmem:[%s776_s4 + $0x30] sm:$0xff]  ;;  %v622_v10 = vld [vmem:[%s776_s4 + $0x28] sm:$0xff]  ;;  %v629_v11 = vld [vmem:[%s776_s4 + $0x20] sm:$0xff]  ;;  %s143_s14 = sld [smem:[#allocation5]]  ;;  %s507_s2 = smov [#allocation7]  }
   0xf   :  { %v636_v12 = vld [vmem:[%s776_s4 + $0x18] sm:$0xff]  ;;  %v643_v13 = vld [vmem:[%s776_s4 + $0x10] sm:$0xff]  ;;  %v650_v14 = vld [vmem:[%s776_s4 + $0x8] sm:$0xff]  ;;  %s418_s15 = sld [smem:[#allocation5 + $0x8]]  ;;  %s382_s3 = sshll.u32 %s507_s2, 4  ;;  %s383_s3 = int_to_ptr.vmem [resolvable:$true] %s382_s3 }
  0x10   :  { %398 = vmatpush.xpose.msk.msra.mxu0 %vm65_vm0, %v559_v1  ;;  %v657_v15 = vld [vmem:[%s776_s4] sm:$0xff]  ;;  %s417_s4 = sld [smem:[#allocation2 + $0x2]]  ;;  %s384_s9 = sshll.u32 %s778_s6, 4  ;;  %s385_s9 = int_to_ptr.hbm [resolvable:$true] %s384_s9 }
  0x11   :  { %v64_v16 = vld [vmem:[%s772_s0] sm:$0xf]  ;;  %v138_v17 = vstv %s137_s11  ;;  %s419_s0 = sld [smem:[#allocation5 + $0x9]] }
  0x12   :  { %v156_v20 = vstv %s415_s12  ;;  %s422_s16 = sld [smem:[#allocation5 + $0xc]] }
  0x13   :  { %v153_v22 = vstv %s414_s13  ;;  %s416_s17 = sld [smem:[#allocation5 + $0x5]] }
  0x14   :  { %399 = vmatpush.xpose.msk.msra.mxu0 %vm65_vm0, %v566_v2  ;;  %v144_v27 = vstv %s143_s14  ;;  %s423_s18 = sld [smem:[#allocation5 + $0xd]] }
  0x15   :  { %v178_v30 = vstv %s418_s15  ;;  %s421_s19 = sld [smem:[#allocation2 + $0x3]] }
  0x16   :  { %v175_v35 = vstv %s417_s4  ;;  %s424_s20 = sld [smem:[#allocation5 + $0xe]] }
  0x17   :  { %v185_v36 = vstv %s419_s0  ;;  %s420_s21 = sld [smem:[#allocation5 + $0xa]] }
  0x18   :  { %400 = vmatpush.xpose.msk.msra.mxu0 %vm65_vm0, %v573_v3  ;;  %v207_v45 = vstv %s422_s16  ;;  %s425_s22 = sld [smem:[#allocation5 + $0xf]] }
  0x19   :  { %v166_v46 = vstv %s416_s17 }
  0x1a   :  { %v214_v49 = vstv %s423_s18 }
  0x1b   :  { %v204_v56 = vstv %s421_s19 }
  0x1c   :  { %401 = vmatpush.xpose.msk.msra.mxu0 %vm65_vm0, %v580_v4  ;;  %v221_v59 = vstv %s424_s20 }
  0x20   :  { %402 = vmatpush.xpose.msk.msra.mxu0 %vm65_vm0, %v587_v5 }
  0x24   :  { %403 = vmatpush.xpose.msk.msra.mxu0 %vm65_vm0, %v594_v6 }
  0x28   :  { %404 = vmatpush.xpose.msk.msra.mxu0 %vm65_vm0, %v601_v7 }
  0x2c   :  { %405 = vmatpush.xpose.msk.msra.mxu0 %vm65_vm0, %v608_v8 }
  0x30   :  { %406 = vmatpush.xpose.msk.msra.mxu0 %vm65_vm0, %v615_v9 }
  0x34   :  { %407 = vmatpush.xpose.msk.msra.mxu0 %vm65_vm0, %v622_v10 }
  0x38   :  { %408 = vmatpush.xpose.msk.msra.mxu0 %vm65_vm0, %v629_v11 }
  0x3c   :  { %409 = vmatpush.xpose.msk.msra.mxu0 %vm65_vm0, %v636_v12 }
  0x40   :  { %410 = vmatpush.xpose.msk.msra.mxu0 %vm65_vm0, %v643_v13 }
  0x44   :  { %411 = vmatpush.xpose.msk.msra.mxu0 %vm65_vm0, %v650_v14 }
  0x48   :  { %412 = vmatpush.xpose.msk.msra.mxu0 %vm65_vm0, %v657_v15 }
  0x4b   :  { %413 = vmatmul.msk.f32.vlgmr.msra.gmra.mxu0 %vm65_vm0, %v64_v16 }
  0xc8   :  { %v134_v18 = vpop.f32.mrf.mxu0 }
  0xc9   :  { %v139_v19 = vadd.f32 %v138_v17, %v134_v18  ;;  %v154_v25 = vadd.f32 %v153_v22, %v134_v18  ;;  %v176_v40 = vadd.f32 %v175_v35, %v134_v18  ;;  %v205_v60 = vadd.f32 %v204_v56, %v134_v18 }
  0xcb   :  { %435 = vtanh.f32 %v139_v19 }
  0xd1   :  { %v665_v21 = vpop.eup %435 }
  0xd2   :  { %v157_v23 = vmul.f32 %v665_v21, %v156_v20  ;;  %v141_v24 = vmul.f32 %v665_v21, %v665_v21  ;;  %v179_v32 = vmul.f32 %v665_v21, %v178_v30  ;;  %v208_v50 = vmul.f32 %v665_v21, %v207_v45  ;;  %v247_v45 = vld [vmem:[%s773_s1 + $0x10] sm:$0xff] }
  0xd3   :  { %v195_v20 = vstv %s420_s21 }
  0xd4   :  { %v159_v26 = vrot.slane %v157_v23, 7  ;;  %v142_v28 = vsub.f32 1.0, %v141_v24  ;;  %v181_v37 = vrot.slane %v179_v32, 6  ;;  %v210_v57 = vrot.slane %v208_v50, 5 }
  0xd6   :  { %v161_v29 = vadd.f32 %v159_v26, %v154_v25  ;;  %v145_v31 = vmul.f32 %v144_v27, %v142_v28  ;;  %v183_v43 = vadd.f32 %v181_v37, %v176_v40  ;;  %v212_v16 = vadd.f32 %v210_v57, %v205_v60 }
  0xd7   :  { %v231_v37 = vstv %s425_s22 }
  0xd8   :  { %437 = vtanh.f32 %v161_v29  ;;  %v146_v33 = vadd.f32 1.0, %v145_v31 }
  0xda   :  { %v147_v34 = vand.u32 2147483647, %v146_v33 }
  0xdc   :  { %v148_v38 = vadd.f32 1e-09, %v147_v34  ;;  %v245_v34 = vld [vmem:[%s773_s1] sm:$0xff] }
  0xde   :  { %v438_v39 = vpop.eup %437  ;;  %439 = vlog2.f32 %v148_v38 }
  0xdf   :  { %v186_v41 = vmul.f32 %v438_v39, %v185_v36  ;;  %v163_v42 = vmul.f32 %v438_v39, %v438_v39  ;;  %v215_v53 = vmul.f32 %v438_v39, %v214_v49  ;;  %v240_v31 = vsel %vm239_vm1, %v665_v21, %v438_v39  ;;  %v246_v39 = vld [vmem:[%s773_s1 + $0x8] sm:$0xff] }
  0xe1   :  { %v188_v44 = vrot.slane %v186_v41, 7  ;;  %v164_v47 = vsub.f32 1.0, %v163_v42  ;;  %v217_v61 = vrot.slane %v215_v53, 6 }
  0xe3   :  { %v190_v48 = vadd.f32 %v188_v44, %v183_v43  ;;  %v167_v51 = vmul.f32 %v166_v46, %v164_v47  ;;  %v219_v22 = vadd.f32 %v217_v61, %v212_v16 }
  0xe4   :  { %v440_v52 = vpop.eup %439 }
  0xe5   :  { %441 = vtanh.f32 %v190_v48  ;;  %v150_v54 = vmul.f32 0.6931472, %v440_v52  ;;  %v168_v55 = vadd.f32 1.0, %v167_v51  ;;  %v248_v48 = vld [vmem:[%s773_s1 + $0x18] sm:$0xff] }
  0xe7   :  { %151 = vst [vmem:[#allocation7] sm:$0x1] %v150_v54  ;;  %v169_v58 = vand.u32 2147483647, %v168_v55 }
  0xe9   :  { %v170_v62 = vadd.f32 1e-09, %v169_v58 }
  0xeb   :  { %v442_v63 = vpop.eup %441  ;;  %443 = vlog2.f32 %v170_v62 }
  0xec   :  { %v222_v17 = vmul.f32 %v442_v63, %v221_v59  ;;  %v192_v19 = vmul.f32 %v442_v63, %v442_v63  ;;  %v242_v33 = vsel %vm241_vm2, %v240_v31, %v442_v63 }
  0xee   :  { %v224_v23 = vrot.slane %v222_v17, 7  ;;  %v193_v24 = vsub.f32 1.0, %v192_v19 }
  0xf0   :  { %v226_v25 = vadd.f32 %v224_v23, %v219_v22  ;;  %v196_v26 = vmul.f32 %v195_v20, %v193_v24 }
  0xf1   :  { %v444_v27 = vpop.eup %443 }
  0xf2   :  { %445 = vtanh.f32 %v226_v25  ;;  %v197_v28 = vadd.f32 1.0, %v196_v26  ;;  %v172_v29 = vmul.f32 0.6931472, %v444_v27 }
  0xf4   :  { %v198_v18 = vand.u32 2147483647, %v197_v28  ;;  %173 = vst [vmem:[#allocation7] sm:$0x2] %v172_v29 }
  0xf6   :  { %v199_v30 = vadd.f32 1e-09, %v198_v18 }
  0xf8   :  { %v446_v32 = vpop.eup %445  ;;  %447 = vlog2.f32 %v199_v30 }
  0xf9   :  { %v244_v35 = vsel %vm243_vm3, %v242_v33, %v446_v32  ;;  %v228_v36 = vmul.f32 %v446_v32, %v446_v32 }
  0xfa   :  { %426 = vmatpush.msk.msra.mxu1 %vm262_vm4, %v244_v35 }
  0xfb   :  { %427 = vmatmul.msk.f32.vlgmr.msra.gmra.mxu1 %vm249_vm5, %v245_v34  ;;  %v229_v38 = vsub.f32 1.0, %v228_v36 }
  0xfd   :  { %v232_v40 = vmul.f32 %v231_v37, %v229_v38 }
  0xfe   :  { %v448_v41 = vpop.eup %447 }
  0xff   :  { %v201_v42 = vmul.f32 0.6931472, %v448_v41  ;;  %v233_v21 = vadd.f32 1.0, %v232_v40 }
 0x101   :  { %202 = vst [vmem:[#allocation7] sm:$0x4] %v201_v42  ;;  %v234_v43 = vand.u32 2147483647, %v233_v21 }
 0x103   :  { %428 = vmatmul.msk.f32.gmra.mxu1 %vm249_vm5, %v246_v39  ;;  %v235_v44 = vadd.f32 1e-09, %v234_v43 }
 0x105   :  { %449 = vlog2.f32 %v235_v44 }
 0x10b   :  { %v450_v46 = vpop.eup %449  ;;  %429 = vmatmul.msk.f32.gmra.mxu1 %vm249_vm5, %v247_v45 }
 0x10c   :  { %v237_v47 = vmul.f32 0.6931472, %v450_v46 }
 0x10e   :  { %238 = vst [vmem:[#allocation7] sm:$0x8] %v237_v47 }
 0x10f   :  { %387 = dma.vmem_to_hbm [thread:$0]  %s383_s3, 64, %s385_s9, [#allocation3]  }
 0x113   :  { %430 = vmatmul.msk.f32.gmra.mxu1 %vm249_vm5, %v248_v48 }
 0x178   :  { %v283_v49 = vpop.f32.mrf.mxu1 }
 0x179   :  { %311 = vxpose.xlu0.b32.start [1/4] (short) %v283_v49, 128 }
 0x180   :  { %v286_v50 = vpop.f32.mrf.mxu1 }
 0x181   :  { %312 = vxpose.xlu0.b32.cont [2/4] (short) %v286_v50, 128 }
 0x188   :  { %v289_v51 = vpop.f32.mrf.mxu1 }
 0x189   :  { %313 = vxpose.xlu0.b32.cont [3/4] (short) %v289_v51, 128 }
 0x190   :  { %v292_v52 = vpop.f32.mrf.mxu1 }
 0x191   :  { %314 = vxpose.xlu0.b32.end [4/4] (short) %v292_v52, 128 }
 0x21d   :  { %v327_v53 = vpop.trf.xlu0 }
 0x21e   :  { %v343_v54 = vadd.f32 %v327_v53, %v657_v15 }
 0x220   :  { %359 = vst.msk [vmem:[%s777_s5] sm:$0xff] %vm65_vm0, %v343_v54 }
 0x225   :  { %v328_v55 = vpop.trf.xlu0 }
 0x226   :  { %v344_v56 = vadd.f32 %v328_v55, %v650_v14 }
 0x228   :  { %360 = vst.msk [vmem:[%s777_s5 + $0x8] sm:$0xff] %vm65_vm0, %v344_v56 }
 0x22d   :  { %v329_v57 = vpop.trf.xlu0 }
 0x22e   :  { %v345_v58 = vadd.f32 %v329_v57, %v643_v13 }
 0x230   :  { %361 = vst.msk [vmem:[%s777_s5 + $0x10] sm:$0xff] %vm65_vm0, %v345_v58 }
 0x235   :  { %v330_v15 = vpop.trf.xlu0 }
 0x236   :  { %v346_v59 = vadd.f32 %v330_v15, %v636_v12 }
 0x238   :  { %362 = vst.msk [vmem:[%s777_s5 + $0x18] sm:$0xff] %vm65_vm0, %v346_v59 }
 0x23d   :  { %v331_v14 = vpop.trf.xlu0 }
 0x23e   :  { %v347_v60 = vadd.f32 %v331_v14, %v629_v11 }
 0x240   :  { %363 = vst.msk [vmem:[%s777_s5 + $0x20] sm:$0xff] %vm65_vm0, %v347_v60 }
 0x245   :  { %v332_v13 = vpop.trf.xlu0 }
 0x246   :  { %v348_v61 = vadd.f32 %v332_v13, %v622_v10 }
 0x248   :  { %364 = vst.msk [vmem:[%s777_s5 + $0x28] sm:$0xff] %vm65_vm0, %v348_v61 }
 0x24d   :  { %v333_v12 = vpop.trf.xlu0 }
 0x24e   :  { %v349_v62 = vadd.f32 %v333_v12, %v615_v9 }
 0x250   :  { %365 = vst.msk [vmem:[%s777_s5 + $0x30] sm:$0xff] %vm65_vm0, %v349_v62 }
 0x255   :  { %v334_v11 = vpop.trf.xlu0 }
 0x256   :  { %v350_v63 = vadd.f32 %v334_v11, %v608_v8 }
 0x258   :  { %366 = vst.msk [vmem:[%s777_s5 + $0x38] sm:$0xff] %vm65_vm0, %v350_v63 }
 0x25d   :  { %v335_v10 = vpop.trf.xlu0 }
 0x25e   :  { %v351_v16 = vadd.f32 %v335_v10, %v601_v7 }
 0x260   :  { %367 = vst.msk [vmem:[%s777_s5 + $0x40] sm:$0xff] %vm65_vm0, %v351_v16 }
 0x265   :  { %v336_v9 = vpop.trf.xlu0 }
 0x266   :  { %v352_v17 = vadd.f32 %v336_v9, %v594_v6 }
 0x268   :  { %368 = vst.msk [vmem:[%s777_s5 + $0x48] sm:$0xff] %vm65_vm0, %v352_v17 }
 0x26d   :  { %v337_v8 = vpop.trf.xlu0 }
 0x26e   :  { %v353_v19 = vadd.f32 %v337_v8, %v587_v5 }
 0x270   :  { %369 = vst.msk [vmem:[%s777_s5 + $0x50] sm:$0xff] %vm65_vm0, %v353_v19 }
 0x275   :  { %v338_v7 = vpop.trf.xlu0 }
 0x276   :  { %v354_v20 = vadd.f32 %v338_v7, %v580_v4 }
 0x278   :  { %370 = vst.msk [vmem:[%s777_s5 + $0x58] sm:$0xff] %vm65_vm0, %v354_v20 }
 0x27d   :  { %v339_v6 = vpop.trf.xlu0 }
 0x27e   :  { %v355_v22 = vadd.f32 %v339_v6, %v573_v3 }
 0x280   :  { %371 = vst.msk [vmem:[%s777_s5 + $0x60] sm:$0xff] %vm65_vm0, %v355_v22 }
 0x285   :  { %v340_v5 = vpop.trf.xlu0 }
 0x286   :  { %v356_v23 = vadd.f32 %v340_v5, %v566_v2 }
 0x288   :  { %372 = vst.msk [vmem:[%s777_s5 + $0x68] sm:$0xff] %vm65_vm0, %v356_v23 }
 0x28d   :  { %v341_v4 = vpop.trf.xlu0 }
 0x28e   :  { %v357_v24 = vadd.f32 %v341_v4, %v559_v1 }
 0x290   :  { %373 = vst.msk [vmem:[%s777_s5 + $0x70] sm:$0xff] %vm65_vm0, %v357_v24 }
 0x295   :  { %v342_v3 = vpop.trf.xlu0 }
 0x296   :  { %v358_v25 = vadd.f32 %v342_v3, %v552_v0 }
 0x298   :  { %374 = vst.msk [vmem:[%s777_s5 + $0x78] sm:$0xff] %vm65_vm0, %v358_v25 }
 0x299   :  { %503 = dma.done.wait [#allocation3], 64  }
 0x29a   :  { %504 = vsyncadd [#allocation3], 4294967232 }
 0x29b   :  { %394 = vsyncpa [#allocation3], 1 }
 0x29c   :  { %395 = vsyncpa [#allocation4], 1 }
 0x29d   :  { %396 = vsyncpa [#allocation6], 1 }

</bundles_post_ra>
